<compile_context>
chip_gen: v5e
topology: v5e:2x2
jax: 0.10.0
libtpu: 0.0.40
codegen_flags: <defaults>
</compile_context>

<pallas_src>
import functools

import jax
import jax.numpy as jnp
from jax.experimental import pallas as pl
from jax.experimental.pallas import tpu as pltpu

_SUBLANE = 8


def _round_up(x, m):
    return ((x + m - 1) // m) * m


def _linear_kernel(x_ref, w_ref, b_ref, o_ref):
    # x_ref: (tm, K) native dtype   w_ref: (K, N)   b_ref: (1, N) f32   o_ref: (tm, N) f32
    x = x_ref[...].astype(w_ref.dtype)  # cast in VMEM (no extra HBM pass)
    o_ref[...] = (
        jnp.dot(x, w_ref[...], preferred_element_type=jnp.float32) + b_ref[...]
    )


def prepare_embedding_mw_params(weight, bias, param_dtype=jnp.float32):
    """One-time prep of PyTorch-layout Linear params.

    weight: (embedding_dim, num_bins) -> transposed to (num_bins, embedding_dim)
    bias:   (embedding_dim,)          -> (1, embedding_dim), kept fp32.
    param_dtype=jnp.bfloat16 halves weight traffic and is bf16-MXU-native on
    v6e/v7x, at the cost of a small precision delta vs PyTorch fp32.
    No lane padding: the kernel uses full-dim (unpadded) N blocks.
    """
    w_t = weight.T.astype(param_dtype)                   # (K, N)
    b_row = bias.astype(jnp.float32).reshape(1, -1)      # (1, N)
    return w_t, b_row


@functools.partial(jax.jit, static_argnames=("tm",))
def embedding_mw_forward(x, w_t, bias_row, *, tm=4096):
    """y = x.float() @ weight.T + bias  (Pallas TPU kernel).

    x:        (..., num_bins)              any float/int dtype (cast in-kernel)
    w_t:      (num_bins, embedding_dim)    from prepare_embedding_mw_params
    bias_row: (1, embedding_dim)           from prepare_embedding_mw_params
    Returns (..., embedding_dim) float32.
    """
    lead_shape = x.shape[:-1]
    k_in = x.shape[-1]
    k_w, n_out = w_t.shape
    assert k_w == k_in, f"num_bins mismatch: x has {k_in}, weight has {k_w}"

    x2d = x.reshape(-1, k_in)
    m_rows = x2d.shape[0]

    if m_rows == 0:  # empty batch: nothing to launch
        return jnp.zeros((*lead_shape, n_out), jnp.float32)

    # M tile selection:
    #   tiny M        -> single full-dim block (always legal);
    #   moderate M    -> split into >=2 blocks so v7x's 2 TensorCores both get work;
    #   large M       -> tm-row blocks (ragged tail masked by Pallas).
    if m_rows <= 2 * _SUBLANE:
        tm_eff = m_rows
    elif m_rows <= 2 * tm:
        tm_eff = _round_up(pl.cdiv(m_rows, 2), _SUBLANE)
    else:
        tm_eff = _round_up(tm, _SUBLANE)
    grid = (pl.cdiv(m_rows, tm_eff),)

    # Scheduling hint for XLA (unpadded output bytes).
    in_bytes = x2d.size * x2d.dtype.itemsize
    w_bytes = w_t.size * w_t.dtype.itemsize + bias_row.size * bias_row.dtype.itemsize
    out_bytes = m_rows * n_out * 4
    cost = pl.CostEstimate(
        flops=2 * m_rows * k_in * n_out,
        transcendentals=0,
        bytes_accessed=in_bytes + w_bytes + out_bytes,
    )

    # VMEM budget: double-buffered x/out tiles + (double-buffered) resident weight/bias,
    # plus a few MiB of headroom. No inflated floor/cap -> v7x-friendly.
    est = 2 * (
        tm_eff * k_in * x2d.dtype.itemsize
        + tm_eff * n_out * 4
        + k_in * n_out * w_t.dtype.itemsize
        + n_out * 4
    )
    vmem_limit = int(est + (4 << 20))

    out = pl.pallas_call(
        _linear_kernel,
        out_shape=jax.ShapeDtypeStruct((m_rows, n_out), jnp.float32),
        grid_spec=pltpu.PrefetchScalarGridSpec(
            num_scalar_prefetch=0,
            grid=grid,
            in_specs=[
                pl.BlockSpec((tm_eff, k_in), lambda i: (i, 0)),  # streaming x tiles
                pl.BlockSpec((k_in, n_out), lambda i: (0, 0)),   # resident weight
                pl.BlockSpec((1, n_out), lambda i: (0, 0)),      # resident bias row
            ],
            out_specs=pl.BlockSpec((tm_eff, n_out), lambda i: (i, 0)),
        ),
        compiler_params=pltpu.CompilerParams(
            dimension_semantics=("parallel",),   # shards blocks across v7x's 2 TCs
            vmem_limit_bytes=vmem_limit,
        ),
        cost_estimate=cost,
    )(x2d, w_t, bias_row)

    return out.reshape(*lead_shape, n_out)


def init_embedding_mw_params(key, num_bins, embedding_dim):
    """nn.Linear default init: U(-1/sqrt(in), 1/sqrt(in)); PyTorch layout."""
    kw, kb = jax.random.split(key)
    bound = 1.0 / (num_bins ** 0.5)
    weight = jax.random.uniform(
        kw, (embedding_dim, num_bins), jnp.float32, -bound, bound)
    bias = jax.random.uniform(
        kb, (embedding_dim,), jnp.float32, -bound, bound)
    return weight, bias


if __name__ == "__main__":
    key = jax.random.PRNGKey(0)
    k_x, k_p, k_x2 = jax.random.split(key, 3)

    # Small shapes consistent with the module: spectrum of num_bins per token.
    batch, seq = 2, 8
    num_bins, embedding_dim = 32, 32

    x = jax.random.normal(k_x, (batch, seq, num_bins), dtype=jnp.float32)
    weight, bias = init_embedding_mw_params(k_p, num_bins, embedding_dim)

    # One-time param prep (transpose only; no lane padding), hoisted out of forward.
    w_t, b_row = prepare_embedding_mw_params(weight, bias)

    y = embedding_mw_forward(x, w_t, b_row)
    jax.block_until_ready(y)

    y_ref = x.astype(jnp.float32) @ weight.T + bias
    assert y.shape == (batch, seq, embedding_dim)
    assert jnp.allclose(y, y_ref, atol=1e-5, rtol=1e-5)

    # Second check: >=2 grid blocks (megacore path) with a ragged final M tile.
    x_big = jax.random.normal(k_x2, (3, 200, num_bins), dtype=jnp.float32)  # M=600
    y_big = embedding_mw_forward(x_big, w_t, b_row)
    jax.block_until_ready(y_big)
    y_big_ref = x_big @ weight.T + bias
    assert jnp.allclose(y_big, y_big_ref, atol=1e-5, rtol=1e-5)

    print("KERNEL_OK")
</pallas_src>

<mosaic_0001>
module attributes {stable_mosaic.version = 11 : i64} {
  func.func @_linear_kernel(%arg0: i32, %arg1: memref<16x32xf32, #tpu.memory_space<vmem>>, %arg2: memref<32x32xf32, #tpu.memory_space<vmem>>, %arg3: memref<1x32xf32, #tpu.memory_space<vmem>>, %arg4: memref<16x32xf32, #tpu.memory_space<vmem>>) attributes {dimension_semantics = [#tpu.dimension_semantics<parallel>], iteration_bounds = array<i64: 1>, scalar_prefetch = 0 : i64, scratch_operands = 0 : i64, tpu.core_type = #tpu.core_type<tc>, window_params = [{transform_indices = @transform_0, window_bounds = array<i64: 16, 32>}, {pipeline_mode = #tpu.pipeline_mode<synchronous>, transform_indices = @transform_1, window_bounds = array<i64: 32, 32>}, {pipeline_mode = #tpu.pipeline_mode<synchronous>, transform_indices = @transform_2, window_bounds = array<i64: 1, 32>}, {transform_indices = @transform_3, window_bounds = array<i64: 16, 32>}]} {
    %c0 = arith.constant 0 : index
    %c0_0 = arith.constant 0 : index
    %0 = vector.load %arg1[%c0, %c0_0] : memref<16x32xf32, #tpu.memory_space<vmem>>, vector<16x32xf32>
    %c0_1 = arith.constant 0 : index
    %c0_2 = arith.constant 0 : index
    %1 = vector.load %arg2[%c0_1, %c0_2] : memref<32x32xf32, #tpu.memory_space<vmem>>, vector<32x32xf32>
    %cst = arith.constant dense<0.000000e+00> : vector<16x32xf32>
    %2 = tpu.matmul %0, %1, %cst {dimension_numbers = #tpu.dot_dimension_numbers<[1], [0], [0], [1], [0, 0, 1, 1], [], []>} : vector<16x32xf32>, vector<32x32xf32>, vector<16x32xf32> -> vector<16x32xf32>
    %c0_3 = arith.constant 0 : index
    %c0_4 = arith.constant 0 : index
    %3 = vector.load %arg3[%c0_3, %c0_4] : memref<1x32xf32, #tpu.memory_space<vmem>>, vector<1x32xf32>
    %4 = vector.broadcast %3 : vector<1x32xf32> to vector<16x32xf32>
    %5 = arith.addf %2, %4 : vector<16x32xf32>
    %c0_5 = arith.constant 0 : index
    %c0_6 = arith.constant 0 : index
    %6 = vector.load %arg4[%c0_5, %c0_6] : memref<16x32xf32, #tpu.memory_space<vmem>>, vector<16x32xf32>
    tpu.vector_store %arg4[%c0_5, %c0_6], %5 {strides = array<i32>} : memref<16x32xf32, #tpu.memory_space<vmem>>, vector<16x32xf32>,
    return
  }
  func.func @transform_0(%arg0: i32) -> (i32, i32) {
    %c0_i32 = arith.constant 0 : i32
    %c0_i32_0 = arith.constant 0 : i32
    return %arg0, %c0_i32 : i32, i32
  }
  func.func @transform_1(%arg0: i32) -> (i32, i32) {
    %c0_i32 = arith.constant 0 : i32
    %c0_i32_0 = arith.constant 0 : i32
    %c0_i32_1 = arith.constant 0 : i32
    return %c0_i32, %c0_i32_0 : i32, i32
  }
  func.func @transform_2(%arg0: i32) -> (i32, i32) {
    %c0_i32 = arith.constant 0 : i32
    %c0_i32_0 = arith.constant 0 : i32
    %c0_i32_1 = arith.constant 0 : i32
    return %c0_i32, %c0_i32_0 : i32, i32
  }
  func.func @transform_3(%arg0: i32) -> (i32, i32) {
    %c0_i32 = arith.constant 0 : i32
    %c0_i32_0 = arith.constant 0 : i32
    return %arg0, %c0_i32 : i32, i32
  }
}

</mosaic_0001>

<bundles_post_ra>
// kernel: embedding_mw_forward.1
= control target key start
LH: loop header
LB: loop body
LE: loop exit
PB: predicated region body
PF: predicated region fallthrough
CT: control target
= control target key end

     0   :  { %8 = vsyncpa [#allocation3], 0  ;;  %s249_s0 = inlined_call_operand.hbm [shape: f32[16,32], index: 0, kind: input, shape index: {}]   ;;  %s250_s1 = inlined_call_operand.hbm [shape: f32[32,32], index: 1, kind: input, shape index: {}]   ;;  %s251_s2 = inlined_call_operand.vmem [shape: f32[1,32], index: 2, kind: input, shape index: {}]   ;;  %s252_s3 = inlined_call_operand.hbm [shape: f32[16,32], index: 3, kind: output, shape index: {}]  }
   0x1   :  { %9 = vsyncpa [#allocation6], 0 }
   0x2   :  { %10 = vsyncpa [#allocation4], 0  ;;  %s15_s14 = sshll.u32 %s249_s0, 4  ;;  %s199_s15 = smov [#allocation2]   ;;  %s16_s14 = int_to_ptr.hbm [resolvable:$true] %s15_s14 }
   0x3   :  { %s17_s16 = sshll.u32 %s199_s15, 4  ;;  %s28_s19 = sshll.u32 %s250_s1, 4  ;;  %s18_s16 = int_to_ptr.vmem [resolvable:$true] %s17_s16  ;;  %s29_s19 = int_to_ptr.hbm [resolvable:$true] %s28_s19 }
   0x4   :  { %s200_s20 = smov 128   ;;  %s201_s21 = smov 8  }
   0x5   :  { %23 = dma.hbm_to_vmem [thread:$0]  %s16_s14, 256, %s18_s16, [#allocation3], %s200_s20, %s200_s20, %s201_s21  }
   0x6   :  { %s202_s22 = smov [#allocation5]  }
   0x7   :  { %s30_s23 = sshll.u32 %s202_s22, 4  ;;  %s31_s23 = int_to_ptr.vmem [resolvable:$true] %s30_s23 }
   0x8   :  { %36 = dma.hbm_to_vmem [thread:$0]  %s29_s19, 512, %s31_s23, [#allocation6], %s200_s20, %s200_s20, %s201_s21  }
   0x9   :  { %193 = dma.done.wait [#allocation3], 256  }
   0xa   :  { %194 = vsyncadd [#allocation3], 4294967040 }
   0xb   :  { %195 = dma.done.wait [#allocation6], 512  }
   0xc   :  { %196 = vsyncadd [#allocation6], 4294966784  ;;  %v52_v0 = vld [vmem:[#allocation5 + $0x18] sm:$0xff]  ;;  %v51_v1 = vld [vmem:[#allocation5 + $0x10] sm:$0xff]  ;;  %vm57_vm0 = vcmask 261120   ;;  %s203_s24 = smov [#allocation7]  }
   0xd   :  { %76 = vmatpush.msra.mxu0 %v52_v0  ;;  %111 = vmatpush.msra.mxu1 %v52_v0  ;;  %v50_v2 = vld [vmem:[#allocation5 + $0x8] sm:$0xff]  ;;  %v49_v3 = vld [vmem:[#allocation5] sm:$0xff]  ;;  %v47_v4 = vld [vmem:[#allocation2] sm:$0xff]  ;;  %s93_s25 = sshll.u32 %s203_s24, 4  ;;  %s95_s28 = sshll.u32 %s252_s3, 4  ;;  %s94_s25 = int_to_ptr.vmem [resolvable:$true] %s93_s25  ;;  %s96_s28 = int_to_ptr.hbm [resolvable:$true] %s95_s28 }
   0xe   :  { %v48_v5 = vld [vmem:[#allocation2 + $0x8] sm:$0xff]  ;;  %v120_v6 = vld [vmem:[%s251_s2] ss:$0 sm:$0xff] }
   0xf   :  { %77 = vmatpush.msra.mxu0 %v51_v1  ;;  %112 = vmatpush.msra.mxu1 %v51_v1 }
  0x11   :  { %78 = vmatpush.msra.mxu0 %v50_v2  ;;  %113 = vmatpush.msra.mxu1 %v50_v2 }
  0x13   :  { %79 = vmatpush.msra.mxu0 %v49_v3  ;;  %114 = vmatpush.msra.mxu1 %v49_v3 }
  0x14   :  { %109 = vmatmul.msk.f32.vlgmr.msra.gmra.mxu0 %vm57_vm0, %v47_v4  ;;  %110 = vmatmul.msk.f32.vlgmr.msra.gmra.mxu1 %vm57_vm0, %v48_v5 }
  0x91   :  { %v81_v7 = vpop.f32.mrf.mxu0  ;;  %v84_v8 = vpop.f32.mrf.mxu1 }
  0x92   :  { %v82_v9 = vadd.f32 %v120_v6, %v81_v7  ;;  %v85_v10 = vadd.f32 %v120_v6, %v84_v8 }
  0x94   :  { %87 = vst.msk [vmem:[#allocation7] sm:$0xff] %vm57_vm0, %v82_v9 }
  0x95   :  { %88 = vst.msk [vmem:[#allocation7 + $0x8] sm:$0xff] %vm57_vm0, %v85_v10 }
  0x96   :  { %101 = dma.vmem_to_hbm [thread:$0]  %s94_s25, 256, %s96_s28, [#allocation4], %s200_s20, %s200_s20, %s201_s21  }
  0x97   :  { %197 = dma.done.wait [#allocation4], 256  }
  0x98   :  { %198 = vsyncadd [#allocation4], 4294967040 }
  0x99   :  { %106 = vsyncpa [#allocation3], 1 }
  0x9a   :  { %107 = vsyncpa [#allocation6], 1 }
  0x9b   :  { %108 = vsyncpa [#allocation4], 1 }

</bundles_post_ra>
